<compile_context>
chip_gen: v6e
topology: v6e:2x2x1
jax: 0.10.0
libtpu: 0.0.40
codegen_flags: <defaults>
</compile_context>

<pallas_src>
import math

import jax
import jax.numpy as jnp
from jax.experimental import pallas as pl
from jax.experimental.pallas import tpu as pltpu


# ----------------------------- kernels --------------------------------------


def _add_kernel(x_ref, y_ref, o_ref):
    # Whole-tile elementwise add on the VPU; dtype promotion in-kernel.
    o_ref[...] = x_ref[...].astype(o_ref.dtype) + y_ref[...].astype(o_ref.dtype)


def _add_scalar_kernel(x_ref, s_ref, o_ref):
    # s_ref is a (1, 1) block resident across the grid; VPU broadcast in-kernel.
    o_ref[...] = x_ref[...].astype(o_ref.dtype) + s_ref[...].astype(o_ref.dtype)


# ----------------------------- helpers ---------------------------------------


def _cdiv(a: int, b: int) -> int:
    return -(-a // b)


def _round_up(a: int, b: int) -> int:
    return _cdiv(a, b) * b


_TARGET_BLOCK_BYTES = 4 * 1024 * 1024   # ~4 MiB per operand block
_VMEM_LIMIT_BYTES = 32 * 1024 * 1024    # 3 operands x 2 buffers x 4 MiB = 24 MiB


def _choose_lanes(total: int):
    """Largest lane-dense (multiple-of-128) last dim that exactly divides total."""
    for lanes in (1024, 512, 256, 128):
        if total >= lanes and total % lanes == 0:
            return lanes, False
    return 128, True  # truly ragged: pad only the tail up to a multiple of 128


def _plan_tiling(total: int, itemsizes):
    max_itemsize = max(itemsizes)
    min_itemsize = min(itemsizes)
    # Per-dtype sublane multiple: f32 -> 8, bf16 -> 16, int8/fp8 -> 32.
    sub = max(8, 32 // max(1, min_itemsize))

    lanes, needs_pad = _choose_lanes(total)
    padded_total = _round_up(total, lanes) if needs_pad else total
    rows = padded_total // lanes

    max_tile_rows = max(sub, (_TARGET_BLOCK_BYTES // (lanes * max_itemsize)) // sub * sub)
    if rows <= sub:
        tile_rows = rows  # single block; sublane dim equals the full array dim
    else:
        # >= 2 grid blocks whenever possible so both v7x TensorCores get work.
        tile_rows = min(max_tile_rows, max(sub, _round_up(_cdiv(rows, 2), sub)))
    grid_rows = _cdiv(rows, tile_rows)  # last block may be partial; Pallas masks it
    return lanes, rows, tile_rows, grid_rows, padded_total, needs_pad


def _as_2d(a, total, lanes, rows, padded_total):
    a1 = a.reshape(-1)
    if padded_total != total:
        # Tail pad only (< lanes elements); hit only for sizes not a multiple of 128.
        a1 = jnp.pad(a1, (0, padded_total - total))
    return a1.reshape(rows, lanes)


# ----------------------------- wrapper ----------------------------------------


def pallas_add(x: jax.Array, y: jax.Array, *, in_place: bool = False) -> jax.Array:
    """Elementwise add via a Pallas TPU kernel (PyTorch `x + y` semantics)."""
    x = jnp.asarray(x)
    y = jnp.asarray(y)
    out_shape = jnp.broadcast_shapes(x.shape, y.shape)
    out_dtype = jnp.result_type(x.dtype, y.dtype)
    total = int(math.prod(out_shape)) if out_shape else 1
    if total == 0:
        return jnp.zeros(out_shape, out_dtype)

    x_size = int(math.prod(x.shape)) if x.shape else 1
    y_size = int(math.prod(y.shape)) if y.shape else 1
    out_itemsize = jnp.dtype(out_dtype).itemsize

    # ---------- scalar-broadcast path: stream big operand, scalar stays resident ----
    if (x_size == 1) != (y_size == 1):
        big, small = (x, y) if y_size == 1 else (y, x)
        itemsizes = [jnp.dtype(big.dtype).itemsize, jnp.dtype(small.dtype).itemsize,
                     out_itemsize]
        lanes, rows, tile_rows, grid_rows, padded_total, _ = _plan_tiling(total, itemsizes)
        big2 = _as_2d(big, total, lanes, rows, padded_total)
        small2 = small.reshape(1, 1)
        out_bytes = rows * lanes * out_itemsize

        out2 = pl.pallas_call(
            _add_scalar_kernel,
            out_shape=jax.ShapeDtypeStruct((rows, lanes), out_dtype),
            grid_spec=pltpu.PrefetchScalarGridSpec(
                num_scalar_prefetch=0,
                grid=(grid_rows,),
                in_specs=[
                    pl.BlockSpec((tile_rows, lanes), lambda i: (i, 0)),
                    pl.BlockSpec((1, 1), lambda i: (0, 0)),
                ],
                out_specs=pl.BlockSpec((tile_rows, lanes), lambda i: (i, 0)),
            ),
            compiler_params=pltpu.CompilerParams(
                dimension_semantics=("parallel",),
                vmem_limit_bytes=_VMEM_LIMIT_BYTES,
            ),
            cost_estimate=pl.CostEstimate(
                flops=total,
                transcendentals=0,
                bytes_accessed=(big2.size * big2.dtype.itemsize
                                + small2.size * small2.dtype.itemsize + out_bytes),
            ),
        )(big2, small2)

        out1 = out2.reshape(-1)
        if padded_total != total:
            out1 = out1[:total]
        return out1.reshape(out_shape)

    # ---------- residual / general path ---------------------------------------------
    x_was_expanded = x.shape != out_shape
    if x_was_expanded:
        # TODO(synk): stream non-scalar broadcast operands unexpanded (in-kernel
        # broadcast via index_map) instead of materializing; the MobileNetV2
        # residual Add always has identical shapes and never hits this.
        x = jnp.broadcast_to(x, out_shape)
    if y.shape != out_shape:
        y = jnp.broadcast_to(y, out_shape)

    itemsizes = [jnp.dtype(x.dtype).itemsize, jnp.dtype(y.dtype).itemsize, out_itemsize]
    lanes, rows, tile_rows, grid_rows, padded_total, needs_pad = _plan_tiling(
        total, itemsizes)

    x2 = _as_2d(x, total, lanes, rows, padded_total)
    y2 = _as_2d(y, total, lanes, rows, padded_total)

    # Aliasing is a memory-footprint optimization only (HBM traffic stays 3N bytes);
    # skip it when a padded/broadcast temporary would be aliased (no benefit).
    io_aliases = {}
    if in_place and not needs_pad and not x_was_expanded and x2.dtype == out_dtype:
        io_aliases = {0: 0}

    out_bytes = rows * lanes * out_itemsize
    out2 = pl.pallas_call(
        _add_kernel,
        out_shape=jax.ShapeDtypeStruct((rows, lanes), out_dtype),
        grid_spec=pltpu.PrefetchScalarGridSpec(
            num_scalar_prefetch=0,
            grid=(grid_rows,),
            in_specs=[
                pl.BlockSpec((tile_rows, lanes), lambda i: (i, 0)),
                pl.BlockSpec((tile_rows, lanes), lambda i: (i, 0)),
            ],
            out_specs=pl.BlockSpec((tile_rows, lanes), lambda i: (i, 0)),
        ),
        compiler_params=pltpu.CompilerParams(
            dimension_semantics=("parallel",),
            vmem_limit_bytes=_VMEM_LIMIT_BYTES,
        ),
        cost_estimate=pl.CostEstimate(
            flops=total,
            transcendentals=0,
            bytes_accessed=(x2.size * x2.dtype.itemsize
                            + y2.size * y2.dtype.itemsize + out_bytes),
        ),
        input_output_aliases=io_aliases,
    )(x2, y2)

    out1 = out2.reshape(-1)
    if padded_total != total:
        out1 = out1[:total]
    return out1.reshape(out_shape)


# ----------------------------- tests -----------------------------------------


if __name__ == "__main__":
    key = jax.random.PRNGKey(0)
    kx, ky = jax.random.split(key)

    # Residual-add of two NCHW feature maps (MobileNetV2 inverted-residual skip).
    x = jax.random.normal(kx, (2, 4, 16, 16), dtype=jnp.float32)
    y = jax.random.normal(ky, (2, 4, 16, 16), dtype=jnp.float32)
    out = pallas_add(x, y)
    jax.block_until_ready(out)
    ref = x + y
    assert out.shape == ref.shape and out.dtype == ref.dtype, (out.shape, out.dtype)
    assert jnp.allclose(out, ref, atol=1e-6, rtol=1e-6), "mismatch vs reference"

    # Lane-aligned but not tile-aligned (partial last block, no pad copy).
    xp = jax.random.normal(kx, (2, 16, 24, 24), dtype=jnp.float32)
    yp = jax.random.normal(ky, (2, 16, 24, 24), dtype=jnp.float32)
    out_p = pallas_add(xp, yp)
    jax.block_until_ready(out_p)
    assert jnp.allclose(out_p, xp + yp, atol=1e-6, rtol=1e-6), "partial-block mismatch"

    # Truly ragged path (tail padding only).
    xo = jax.random.normal(kx, (3, 5, 7), dtype=jnp.float32)
    yo = jax.random.normal(ky, (3, 5, 7), dtype=jnp.float32)
    out_o = pallas_add(xo, yo)
    jax.block_until_ready(out_o)
    assert jnp.allclose(out_o, xo + yo, atol=1e-6, rtol=1e-6), "ragged path mismatch"

    # Mixed-dtype path (promotion happens inside the kernel).
    xb = x.astype(jnp.bfloat16)
    out_m = pallas_add(xb, y)
    jax.block_until_ready(out_m)
    assert out_m.dtype == jnp.float32
    assert jnp.allclose(out_m, xb.astype(jnp.float32) + y, atol=1e-6, rtol=1e-6), \
        "mixed dtype mismatch"

    # Scalar broadcast path (scalar stays resident; no broadcast_to in the wrapper).
    s = jnp.float32(1.5)
    out_s = pallas_add(x, s)
    jax.block_until_ready(out_s)
    assert jnp.allclose(out_s, x + s, atol=1e-6, rtol=1e-6), "scalar path mismatch"

    # Non-scalar broadcast (bias-style) fallback.
    bias = jax.random.normal(ky, (1, 4, 1, 1), dtype=jnp.float32)
    out_b = pallas_add(x, bias)
    jax.block_until_ready(out_b)
    assert jnp.allclose(out_b, x + bias, atol=1e-6, rtol=1e-6), "bias path mismatch"

    # In-place (aliased output buffer) residual-add variant — footprint only.
    out_ip = pallas_add(x, y, in_place=True)
    jax.block_until_ready(out_ip)
    assert jnp.allclose(out_ip, ref, atol=1e-6, rtol=1e-6), "aliased path mismatch"

    print("KERNEL_OK")
</pallas_src>

<mosaic_0001>
module attributes {stable_mosaic.version = 11 : i64} {
  func.func @_add_kernel(%arg0: i32, %arg1: memref<2x1024xf32, #tpu.memory_space<vmem>>, %arg2: memref<2x1024xf32, #tpu.memory_space<vmem>>, %arg3: memref<2x1024xf32, #tpu.memory_space<vmem>>) attributes {dimension_semantics = [#tpu.dimension_semantics<parallel>], iteration_bounds = array<i64: 1>, scalar_prefetch = 0 : i64, scratch_operands = 0 : i64, tpu.core_type = #tpu.core_type<tc>, window_params = [{transform_indices = @transform_0, window_bounds = array<i64: 2, 1024>}, {transform_indices = @transform_1, window_bounds = array<i64: 2, 1024>}, {transform_indices = @transform_2, window_bounds = array<i64: 2, 1024>}]} {
    %c0 = arith.constant 0 : index
    %c0_0 = arith.constant 0 : index
    %0 = vector.load %arg1[%c0, %c0_0] : memref<2x1024xf32, #tpu.memory_space<vmem>>, vector<2x1024xf32>
    %c0_1 = arith.constant 0 : index
    %c0_2 = arith.constant 0 : index
    %1 = vector.load %arg2[%c0_1, %c0_2] : memref<2x1024xf32, #tpu.memory_space<vmem>>, vector<2x1024xf32>
    %2 = arith.addf %0, %1 : vector<2x1024xf32>
    %c0_3 = arith.constant 0 : index
    %c0_4 = arith.constant 0 : index
    %3 = vector.load %arg3[%c0_3, %c0_4] : memref<2x1024xf32, #tpu.memory_space<vmem>>, vector<2x1024xf32>
    tpu.vector_store %arg3[%c0_3, %c0_4], %2 {strides = array<i32>} : memref<2x1024xf32, #tpu.memory_space<vmem>>, vector<2x1024xf32>,
    return
  }
  func.func @transform_0(%arg0: i32) -> (i32, i32) {
    %c0_i32 = arith.constant 0 : i32
    %c0_i32_0 = arith.constant 0 : i32
    return %arg0, %c0_i32 : i32, i32
  }
  func.func @transform_1(%arg0: i32) -> (i32, i32) {
    %c0_i32 = arith.constant 0 : i32
    %c0_i32_0 = arith.constant 0 : i32
    return %arg0, %c0_i32 : i32, i32
  }
  func.func @transform_2(%arg0: i32) -> (i32, i32) {
    %c0_i32 = arith.constant 0 : i32
    %c0_i32_0 = arith.constant 0 : i32
    return %arg0, %c0_i32 : i32, i32
  }
}

</mosaic_0001>

<bundles_post_ra>
// kernel: tpu_custom_call.1
= control target key start
LH: loop header
LB: loop body
LE: loop exit
PB: predicated region body
PF: predicated region fallthrough
CT: control target
= control target key end

     0   :  { %7 = vsyncpa [#allocation3], 0  ;;  %s156_s0 = inlined_call_operand.hbm [shape: f32[2,1024], index: 0, kind: input, shape index: {}]   ;;  %s157_s1 = inlined_call_operand.hbm [shape: f32[2,1024], index: 1, kind: input, shape index: {}]   ;;  %s158_s2 = inlined_call_operand.hbm [shape: f32[2,1024], index: 2, kind: output, shape index: {}]  }
   0x1   :  { %8 = vsyncpa [#allocation6], 0 }
   0x2   :  { %9 = vsyncpa [#allocation4], 0  ;;  %s129_s9 = smov [#allocation2]   ;;  %s130_s11 = smov [#allocation5]  }
   0x3   :  { %s16_s10 = sshll.u32 %s129_s9, 4  ;;  %s26_s12 = sshll.u32 %s130_s11, 4  ;;  %s17_s10 = int_to_ptr.vmem [resolvable:$true] %s16_s10  ;;  %s27_s12 = int_to_ptr.vmem [resolvable:$true] %s26_s12 }
   0x4   :  { %s71_s13 = scalar_lea.vmem %s17_s10, 256  ;;  %p76_p1 = scmp.lt.s32.totalorder %s17_s10, %s17_s10 }
   0x5   :  { %p72_p0 = scmp.ne.s32.totalorder %s17_s10, %s71_s13  ;;  %p77_p2 = scmp.lt.s32.totalorder %s71_s13, %s71_s13 }
   0x7   :  { %p78_p3 = por %p77_p2, %p76_p1 }
   0x9   :  { %p79_p4 = pnand %p78_p3, %p72_p0 }
   0xb   :  { %82 = shalt.err (!%p79_p4)
}
   0xc   :  { %19 = dma.hbm_to_vmem [thread:$0]  %s156_s0, 256, %s17_s10, [#allocation3]  }
   0xd   :  { %s91_s16 = scalar_lea.vmem %s27_s12, 256  ;;  %p96_p6 = scmp.lt.s32.totalorder %s27_s12, %s27_s12 }
   0xe   :  { %p92_p5 = scmp.ne.s32.totalorder %s27_s12, %s91_s16  ;;  %p97_p7 = scmp.lt.s32.totalorder %s91_s16, %s91_s16 }
  0x10   :  { %p98_p8 = por %p97_p7, %p96_p6 }
  0x12   :  { %p99_p9 = pnand %p98_p8, %p92_p5 }
  0x14   :  { %102 = shalt.err (!%p99_p9)
}
  0x15   :  { %29 = dma.hbm_to_vmem [thread:$0]  %s157_s1, 256, %s27_s12, [#allocation6]  }
  0x16   :  { %123 = dma.done.wait [#allocation3], 256  }
  0x17   :  { %124 = vsyncadd [#allocation3], 4294967040 }
  0x18   :  { %125 = dma.done.wait [#allocation6], 256  }
  0x19   :  { %126 = vsyncadd [#allocation6], 4294967040  ;;  %s131_s19 = smov [#allocation7]   ;;  %v36_v0 = vld [vmem:[#allocation2] sm:$0xff]  ;;  %v38_v1 = vld [vmem:[#allocation5] sm:$0xff] }
  0x1a   :  { %s50_s20 = sshll.u32 %s131_s19, 4  ;;  %v37_v2 = vld [vmem:[#allocation2 + $0x8] sm:$0xff]  ;;  %v40_v3 = vadd.f32 %v38_v1, %v36_v0  ;;  %v39_v4 = vld [vmem:[#allocation5 + $0x8] sm:$0xff]  ;;  %s51_s20 = int_to_ptr.vmem [resolvable:$true] %s50_s20 }
  0x1b   :  { %v41_v5 = vadd.f32 %v39_v4, %v37_v2  ;;  %s103_s0 = scalar_lea.vmem %s51_s20, 256  ;;  %p108_p11 = scmp.lt.s32.totalorder %s51_s20, %s51_s20 }
  0x1c   :  { %42 = vst [vmem:[#allocation7] sm:$0xff] %v40_v3  ;;  %p104_p10 = scmp.ne.s32.totalorder %s51_s20, %s103_s0  ;;  %p109_p12 = scmp.lt.s32.totalorder %s103_s0, %s103_s0 }
  0x1d   :  { %43 = vst [vmem:[#allocation7 + $0x8] sm:$0xff] %v41_v5 }
  0x1e   :  { %p110_p13 = por %p109_p12, %p108_p11 }
  0x20   :  { %p111_p0 = pnand %p110_p13, %p104_p10 }
  0x22   :  { %114 = shalt.err (!%p111_p0)
}
  0x23   :  { %53 = dma.vmem_to_hbm [thread:$0]  %s51_s20, 256, %s158_s2, [#allocation4]  }
  0x24   :  { %127 = dma.done.wait [#allocation4], 256  }
  0x25   :  { %128 = vsyncadd [#allocation4], 4294967040 }
  0x26   :  { %57 = vsyncpa [#allocation3], 1 }
  0x27   :  { %58 = vsyncpa [#allocation6], 1 }
  0x28   :  { %59 = vsyncpa [#allocation4], 1 }

</bundles_post_ra>
